<compile_context>
chip_gen: v5e
topology: v5e:2x2
jax: 0.10.0
libtpu: 0.0.40
codegen_flags: <defaults>
</compile_context>

<pallas_src>
from typing import NamedTuple, Optional

import jax
import jax.numpy as jnp
from jax.experimental import pallas as pl
from jax.experimental.pallas import tpu as pltpu


def _vmem_capacity_bytes() -> int:
    """Physical per-TensorCore VMEM; conservative fallback if query fails."""
    try:
        info = pltpu.get_tpu_info()
        cap = getattr(info, "vmem_capacity_bytes", None)
        if cap:
            return int(cap)
    except Exception:
        pass
    return 64 << 20  # v7x-sized fallback (safe on all generations)


class PreparedHeadWeight(NamedTuple):
    w_kv: jax.Array      # (K, Vp): transposed, padded, optionally cast -- done ONCE
    vocab_size: int      # original V
    n_embd: int          # K
    tn: int              # vocab tile width used for padding / the grid


def prepare_output_head_weight(weight, *, tn: Optional[int] = None,
                               compute_dtype=None) -> PreparedHeadWeight:
    """One-time (parameter-load-time) prep of the PyTorch Linear weight (V, K).

    Does the cast (e.g. bf16), the transpose to (K, V) and the vocab pad once,
    so the per-call forward only streams the weight a single time from HBM.
    """
    V, K = weight.shape
    if compute_dtype is not None:
        weight = weight.astype(compute_dtype)
    w_itemsize = jnp.dtype(weight.dtype).itemsize

    cap = _vmem_capacity_bytes()
    if tn is None:
        # 128-MiB-VMEM chips (v5e/v6e) can afford bigger vocab tiles than v7x.
        tn = 2048 if cap >= (100 << 20) else 1024

    V128 = ((V + 127) // 128) * 128
    # Double-buffered weight tiles get ~60% of ~85% of physical VMEM; the rest
    # covers the resident activation block, output tiles and Mosaic scratch.
    w_budget = int(0.6 * 0.85 * cap)
    tn_vmem_max = max(128, (w_budget // (2 * K * w_itemsize)) // 128 * 128)
    tn_eff = max(128, (min(tn, V128, tn_vmem_max) // 128) * 128)

    Vp = ((V128 + tn_eff - 1) // tn_eff) * tn_eff
    w_kv = weight.T                        # (K, V) -- natural contraction layout
    if Vp != V:
        w_kv = jnp.pad(w_kv, ((0, 0), (0, Vp - V)))
    return PreparedHeadWeight(w_kv=w_kv, vocab_size=V, n_embd=K, tn=tn_eff)


def _head_matmul_kernel(x_ref, w_ref, o_ref):
    # x_ref: (Mp, K) resident activations; w_ref: (K, tn) weight tile;
    # o_ref: (Mp, tn) lane-dense output tile.  Natural contraction -> no
    # in-kernel transpose; f32 accumulation on the MXU.
    o_ref[...] = jnp.dot(
        x_ref[...], w_ref[...], preferred_element_type=jnp.float32
    ).astype(o_ref.dtype)


def output_head_forward(x, head_weight, out_times, *, tn: Optional[int] = None,
                        compute_dtype=None):
    """x: (B, T, n_embd).  head_weight: PreparedHeadWeight (preferred) or a raw
    PyTorch-layout (vocab_size, n_embd) array (compat path: prep happens per
    call).  Returns (B, out_times, vocab_size) in x.dtype."""
    if not isinstance(head_weight, PreparedHeadWeight):
        # Compatibility path; prefer preparing once at parameter-load time.
        head_weight = prepare_output_head_weight(
            head_weight, tn=tn, compute_dtype=compute_dtype)

    B, T, K = x.shape
    assert K == head_weight.n_embd
    V = head_weight.vocab_size
    w_kv = head_weight.w_kv
    _, Vp = w_kv.shape
    tn_eff = head_weight.tn
    n_steps = Vp // tn_eff

    out_dtype = x.dtype

    # Glue: slice the last out_times positions before the matmul (tiny).
    x_sl = x[:, -out_times:, :]
    M = B * out_times
    x2d = x_sl.reshape(M, K)
    if compute_dtype is not None:
        x2d = x2d.astype(compute_dtype)   # activations are tiny; cheap per call

    x_itemsize = jnp.dtype(x2d.dtype).itemsize
    w_itemsize = jnp.dtype(w_kv.dtype).itemsize
    o_itemsize = jnp.dtype(out_dtype).itemsize

    # Pad M to a full sublane group (8 for 32-bit, 16 for 16-bit packing).
    m_align = 8 if x_itemsize >= 4 else 16
    Mp = ((M + m_align - 1) // m_align) * m_align
    if Mp != M:
        x2d = jnp.pad(x2d, ((0, Mp - M), (0, 0)))

    cap = _vmem_capacity_bytes()
    vmem_needed = (
        2 * Mp * K * x_itemsize           # resident x (assume double-buffered)
        + 2 * tn_eff * K * w_itemsize     # double-buffered weight tiles
        + 2 * Mp * tn_eff * o_itemsize    # double-buffered output tiles
    )
    vmem_limit = int(min(max(int(1.5 * vmem_needed), 32 << 20), int(0.85 * cap)))

    cost = pl.CostEstimate(
        flops=2 * M * K * V,
        transcendentals=0,
        bytes_accessed=V * K * w_itemsize + M * K * x_itemsize + M * V * o_itemsize,
    )

    out2d = pl.pallas_call(
        _head_matmul_kernel,
        out_shape=jax.ShapeDtypeStruct((Mp, Vp), out_dtype),
        grid_spec=pltpu.PrefetchScalarGridSpec(
            num_scalar_prefetch=0,
            grid=(n_steps,),
            in_specs=[
                # Whole activation block, resident across all N steps.
                pl.BlockSpec((Mp, K), lambda j: (0, 0)),
                # Weight streamed in pre-transposed (K, V) layout, tiled along V.
                pl.BlockSpec((K, tn_eff), lambda j: (0, j)),
            ],
            out_specs=pl.BlockSpec((Mp, tn_eff), lambda j: (0, j)),
        ),
        compiler_params=pltpu.CompilerParams(
            dimension_semantics=("parallel",),   # shards N across v7x's 2 TCs
            vmem_limit_bytes=vmem_limit,
        ),
        cost_estimate=cost,
    )(x2d, w_kv)

    return out2d[:M, :V].reshape(B, out_times, V)


if __name__ == "__main__":
    # Small config consistent with the module: n_embd=32, vocab_size=128,
    # batch=2, seq=8, out_times=4.
    B, T, n_embd, vocab_size, out_times = 2, 8, 32, 128, 4

    key = jax.random.PRNGKey(0)
    kx, kw = jax.random.split(key)
    x = jax.random.normal(kx, (B, T, n_embd), dtype=jnp.float32)
    # head.weight.data.normal_(mean=0.0, std=0.02); PyTorch layout (V, n_embd).
    weight = 0.02 * jax.random.normal(kw, (vocab_size, n_embd), dtype=jnp.float32)

    # Pure-JAX reference.
    ref = (x @ weight.T)[:, -out_times:, :]

    # f32 path, weight prepared once at "parameter-load time": strict check.
    w_f32 = prepare_output_head_weight(weight)
    out = output_head_forward(x, w_f32, out_times)
    out = jax.block_until_ready(out)
    assert out.shape == (B, out_times, vocab_size)
    assert jnp.allclose(out, ref, atol=1e-5, rtol=1e-5)

    # bf16-streamed path (production default for this bandwidth-bound head):
    # weight cast/transpose/pad hoisted to prep; f32 accumulation in-kernel.
    w_bf16 = prepare_output_head_weight(weight, compute_dtype=jnp.bfloat16)
    out_bf16 = output_head_forward(x, w_bf16, out_times, compute_dtype=jnp.bfloat16)
    out_bf16 = jax.block_until_ready(out_bf16)
    assert out_bf16.shape == (B, out_times, vocab_size)
    assert jnp.allclose(out_bf16, ref, atol=2e-2, rtol=2e-2)

    print("KERNEL_OK")
</pallas_src>

<mosaic_0001>
module attributes {stable_mosaic.version = 11 : i64} {
  func.func @_head_matmul_kernel(%arg0: i32, %arg1: memref<8x32xf32, #tpu.memory_space<vmem>>, %arg2: memref<32x128xf32, #tpu.memory_space<vmem>>, %arg3: memref<8x128xf32, #tpu.memory_space<vmem>>) attributes {dimension_semantics = [#tpu.dimension_semantics<parallel>], iteration_bounds = array<i64: 1>, scalar_prefetch = 0 : i64, scratch_operands = 0 : i64, tpu.core_type = #tpu.core_type<tc>, window_params = [{pipeline_mode = #tpu.pipeline_mode<synchronous>, transform_indices = @transform_0, window_bounds = array<i64: 8, 32>}, {transform_indices = @transform_1, window_bounds = array<i64: 32, 128>}, {transform_indices = @transform_2, window_bounds = array<i64: 8, 128>}]} {
    %c0 = arith.constant 0 : index
    %c0_0 = arith.constant 0 : index
    %0 = vector.load %arg1[%c0, %c0_0] : memref<8x32xf32, #tpu.memory_space<vmem>>, vector<8x32xf32>
    %c0_1 = arith.constant 0 : index
    %c0_2 = arith.constant 0 : index
    %1 = vector.load %arg2[%c0_1, %c0_2] : memref<32x128xf32, #tpu.memory_space<vmem>>, vector<32x128xf32>
    %cst = arith.constant dense<0.000000e+00> : vector<8x128xf32>
    %2 = tpu.matmul %0, %1, %cst {dimension_numbers = #tpu.dot_dimension_numbers<[1], [0], [0], [1], [0, 0, 1, 1], [], []>} : vector<8x32xf32>, vector<32x128xf32>, vector<8x128xf32> -> vector<8x128xf32>
    %c0_3 = arith.constant 0 : index
    %c0_4 = arith.constant 0 : index
    %3 = vector.load %arg3[%c0_3, %c0_4] : memref<8x128xf32, #tpu.memory_space<vmem>>, vector<8x128xf32>
    tpu.vector_store %arg3[%c0_3, %c0_4], %2 {strides = array<i32>} : memref<8x128xf32, #tpu.memory_space<vmem>>, vector<8x128xf32>,
    return
  }
  func.func @transform_0(%arg0: i32) -> (i32, i32) {
    %c0_i32 = arith.constant 0 : i32
    %c0_i32_0 = arith.constant 0 : i32
    %c0_i32_1 = arith.constant 0 : i32
    return %c0_i32, %c0_i32_0 : i32, i32
  }
  func.func @transform_1(%arg0: i32) -> (i32, i32) {
    %c0_i32 = arith.constant 0 : i32
    %c0_i32_0 = arith.constant 0 : i32
    return %c0_i32, %arg0 : i32, i32
  }
  func.func @transform_2(%arg0: i32) -> (i32, i32) {
    %c0_i32 = arith.constant 0 : i32
    %c0_i32_0 = arith.constant 0 : i32
    return %c0_i32, %arg0 : i32, i32
  }
}

</mosaic_0001>

<bundles_post_ra>
// kernel: tpu_custom_call.1
= control target key start
LH: loop header
LB: loop body
LE: loop exit
PB: predicated region body
PF: predicated region fallthrough
CT: control target
= control target key end

     0   :  { %7 = vsyncpa [#allocation3], 0  ;;  %s203_s0 = inlined_call_operand.hbm [shape: f32[8,32], index: 0, kind: input, shape index: {}]   ;;  %s204_s1 = inlined_call_operand.hbm [shape: f32[32,128], index: 1, kind: input, shape index: {}]   ;;  %s205_s2 = inlined_call_operand.hbm [shape: f32[8,128], index: 2, kind: output, shape index: {}]  }
   0x1   :  { %8 = vsyncpa [#allocation6], 0 }
   0x2   :  { %9 = vsyncpa [#allocation4], 0  ;;  %s15_s11 = sshll.u32 %s203_s0, 4  ;;  %s174_s12 = smov [#allocation2]   ;;  %s16_s11 = int_to_ptr.hbm [resolvable:$true] %s15_s11 }
   0x3   :  { %s17_s13 = sshll.u32 %s174_s12, 4  ;;  %s25_s16 = sshll.u32 %s204_s1, 4  ;;  %s18_s13 = int_to_ptr.vmem [resolvable:$true] %s17_s13  ;;  %s26_s16 = int_to_ptr.hbm [resolvable:$true] %s25_s16 }
   0x4   :  { %20 = dma.hbm_to_vmem [thread:$0]  %s16_s11, 128, %s18_s13, [#allocation3]  }
   0x5   :  { %s175_s17 = smov [#allocation5]   ;;  %s176_s19 = smov 128  }
   0x6   :  { %s27_s18 = sshll.u32 %s175_s17, 4  ;;  %s177_s20 = smov 8   ;;  %s28_s18 = int_to_ptr.vmem [resolvable:$true] %s27_s18 }
   0x7   :  { %33 = dma.hbm_to_vmem [thread:$0]  %s26_s16, 512, %s28_s18, [#allocation6], %s176_s19, %s176_s19, %s177_s20  }
   0x8   :  { %168 = dma.done.wait [#allocation3], 128  }
   0x9   :  { %169 = vsyncadd [#allocation3], 4294967168 }
   0xa   :  { %170 = dma.done.wait [#allocation6], 512  }
   0xb   :  { %171 = vsyncadd [#allocation6], 4294966784  ;;  %v46_v0 = vld [vmem:[#allocation5 + $0x18] sm:$0xff]  ;;  %v45_v1 = vld [vmem:[#allocation5 + $0x10] sm:$0xff]  ;;  %vm47_vm0 = vcmask 261120   ;;  %s178_s0 = smov [#allocation7]  }
   0xc   :  { %63 = vmatpush.msra.mxu0 %v46_v0  ;;  %v44_v2 = vld [vmem:[#allocation5 + $0x8] sm:$0xff]  ;;  %v43_v3 = vld [vmem:[#allocation5] sm:$0xff]  ;;  %v42_v4 = vld [vmem:[#allocation2] sm:$0xff]  ;;  %s77_s1 = sshll.u32 %s178_s0, 4  ;;  %s79_s23 = sshll.u32 %s205_s2, 4  ;;  %s78_s1 = int_to_ptr.vmem [resolvable:$true] %s77_s1  ;;  %s80_s23 = int_to_ptr.hbm [resolvable:$true] %s79_s23 }
   0xe   :  { %64 = vmatpush.msra.mxu0 %v45_v1 }
  0x10   :  { %65 = vmatpush.msra.mxu0 %v44_v2 }
  0x12   :  { %66 = vmatpush.msra.mxu0 %v43_v3 }
  0x13   :  { %90 = vmatmul.msk.f32.vlgmr.msra.gmra.mxu0 %vm47_vm0, %v42_v4 }
  0x90   :  { %v68_v5 = vpop.f32.mrf.mxu0 }
  0x91   :  { %71 = vst [vmem:[#allocation7] sm:$0xff] %v68_v5 }
  0x92   :  { %82 = dma.vmem_to_hbm [thread:$0]  %s78_s1, 128, %s80_s23, [#allocation4]  }
  0x93   :  { %172 = dma.done.wait [#allocation4], 128  }
  0x94   :  { %173 = vsyncadd [#allocation4], 4294967168 }
  0x95   :  { %87 = vsyncpa [#allocation3], 1 }
  0x96   :  { %88 = vsyncpa [#allocation6], 1 }
  0x97   :  { %89 = vsyncpa [#allocation4], 1 }

</bundles_post_ra>
